<compile_context>
chip_gen: v6e
topology: v6e:2x2x1
jax: 0.10.0
libtpu: 0.0.40
codegen_flags: <defaults>
</compile_context>

<pallas_src>
import functools

import jax
import jax.numpy as jnp
from jax import lax
from jax.experimental import pallas as pl
from jax.experimental.pallas import tpu as pltpu

NEG_INF = float("-inf")


def _hard_dtw_kernel(x_ref, o_ref, carry_ref, *, n_tokens, unroll):
    """x_ref / o_ref: (Tt, Bt, Np) VMEM blocks; carry_ref: (Bt, Np) scratch."""
    t_blk = pl.program_id(1)
    tt = x_ref.shape[0]

    # Hoisted shift mask: lane j receives token j-1; the first token of each
    # packed sub-batch (col % n_tokens == 0) is filled with -inf.
    col = lax.broadcasted_iota(jnp.int32, x_ref.shape[1:], 1)
    first_tok = (col % n_tokens) == 0

    def dp_vals(prev):
        shifted = pltpu.roll(prev, shift=1, axis=1)       # XLU lane rotate
        shifted = jnp.where(first_tok, NEG_INF, shifted)
        return jnp.maximum(prev, shifted)

    # First frame of this frame-block: global frame 0 is just the input,
    # otherwise consume the carry (last DP row of the previous frame-block).
    @pl.when(t_blk == 0)
    def _():
        row0 = x_ref[0]
        o_ref[0] = row0
        carry_ref[...] = row0

    @pl.when(t_blk > 0)
    def _():
        row0 = x_ref[0] + dp_vals(carry_ref[...])
        o_ref[0] = row0
        carry_ref[...] = row0

    def body(k, prev):
        new = x_ref[k] + dp_vals(prev)                    # never re-read o_ref
        o_ref[k] = new
        return new

    last = lax.fori_loop(1, tt, body, carry_ref[...], unroll=unroll)
    carry_ref[...] = last


def _run_hard_dtw(xp, *, n_tokens, block_t=None, block_b=None):
    """xp: frame-major, lane-packed (T, Bp, Np).  Returns the same shape."""
    t, bp, np_ = xp.shape
    itemsize = jnp.dtype(xp.dtype).itemsize
    lane_bytes = np_ * itemsize

    # Batch tile: full if small, else a multiple of 8 capped by a VMEM budget.
    if block_b is not None:
        bt = min(block_b, bp)
    elif bp <= 8:
        bt = bp
    else:
        cap = max(8, min(256, ((2 << 20) // max(1, lane_bytes)) // 8 * 8))
        bt = bp if bp <= cap else cap

    # Frame tile: amortize per-grid-step overhead, keep block <= ~4 MiB so the
    # double-buffered in+out footprint stays well under 32 MiB (v7x-safe).
    row_bytes = max(1, bt * lane_bytes)
    if block_t is not None:
        tt = min(block_t, t)
    else:
        tt = max(1, min(t, 128, (4 << 20) // row_bytes))

    unroll = max(1, min(tt - 1, 8))
    kernel = functools.partial(_hard_dtw_kernel, n_tokens=n_tokens, unroll=unroll)

    block = (tt, bt, np_)
    grid = (pl.cdiv(bp, bt), pl.cdiv(t, tt))   # batch outer (parallel), frames inner

    return pl.pallas_call(
        kernel,
        out_shape=jax.ShapeDtypeStruct(xp.shape, xp.dtype),
        grid=grid,
        in_specs=[pl.BlockSpec(block, lambda b, tb: (tb, b, 0))],
        out_specs=pl.BlockSpec(block, lambda b, tb: (tb, b, 0)),
        scratch_shapes=[pltpu.VMEM((bt, np_), xp.dtype)],
        compiler_params=pltpu.CompilerParams(
            dimension_semantics=("parallel", "arbitrary"),
            vmem_limit_bytes=32 * 1024 * 1024,
        ),
    )(xp)


def _lane_pack_factor(b, n):
    """Fold k batches onto the lane axis (free reshape in frame-major layout)
    so stores are lane-dense when the token count is small."""
    if n >= 128 or b <= 1:
        return 1
    target = max(1, 128 // n)
    best = 1
    for k in range(1, b + 1):
        if b % k == 0 and k * n <= 1024:
            best = k
            if k >= target:
                break
    return best


def hard_dtw_tbn(x_tbn, *, block_t=None, block_b=None):
    """HardDTW on a frame-major (T, B, N) tensor (preferred: no transposes)."""
    t, b, n = x_tbn.shape
    if t == 1:
        return x_tbn
    k = _lane_pack_factor(b, n)
    xp = x_tbn.reshape(t, b // k, k * n)          # free reshape (B, N adjacent)
    out = _run_hard_dtw(xp, n_tokens=n, block_t=block_t, block_b=block_b)
    return out.reshape(t, b, n)


def hard_dtw(x_btn, *, block_t=None, block_b=None):
    """PyTorch-parity API on (B, T, N): matches HardDTW.forward.

    NOTE: the two transposes are full HBM passes; production code should keep
    activations frame-major and call hard_dtw_tbn directly.
    """
    out_t = hard_dtw_tbn(jnp.transpose(x_btn, (1, 0, 2)),
                         block_t=block_t, block_b=block_b)
    return jnp.transpose(out_t, (1, 0, 2))


def hard_dtw_ref(x):
    """Pure-JAX reference mirroring the PyTorch loop ((B, T, N) layout)."""
    b, t, n = x.shape

    def step(prev, xi):
        shifted = jnp.concatenate(
            [jnp.full((b, 1), NEG_INF, x.dtype), prev[:, :-1]], axis=-1)
        new = xi + jnp.maximum(prev, shifted)
        return new, new

    first = x[:, 0, :]
    _, rest = lax.scan(step, first, jnp.transpose(x[:, 1:, :], (1, 0, 2)))
    rest = jnp.transpose(rest, (1, 0, 2))
    return jnp.concatenate([first[:, None, :], rest], axis=1)


if __name__ == "__main__":
    # Case 1: the module's nominal small shape (B, T, N) = (2, 8, 16).
    x = jax.random.normal(jax.random.PRNGKey(0), (2, 8, 16), dtype=jnp.float32)
    out = jax.block_until_ready(hard_dtw(x))
    ref = jax.block_until_ready(hard_dtw_ref(x))
    assert not bool(jnp.isnan(out).any()), "NaNs in kernel output (case 1)"
    assert jnp.allclose(out, ref, atol=1e-5, rtol=1e-5), "kernel != reference (case 1)"

    # Case 2: exercises the multi-frame-block carry path and lane packing
    # (8 batches folded onto the lane axis -> 128 lanes, 4 frame blocks).
    x2 = jax.random.normal(jax.random.PRNGKey(0), (16, 32, 16), dtype=jnp.float32)
    out2 = jax.block_until_ready(hard_dtw(x2, block_t=8))
    ref2 = jax.block_until_ready(hard_dtw_ref(x2))
    assert not bool(jnp.isnan(out2).any()), "NaNs in kernel output (case 2)"
    assert jnp.allclose(out2, ref2, atol=1e-5, rtol=1e-5), "kernel != reference (case 2)"

    print("KERNEL_OK")
</pallas_src>

<mosaic_0001>
module attributes {stable_mosaic.version = 11 : i64} {
  func.func @_hard_dtw_kernel(%arg0: i32, %arg1: i32, %arg2: memref<8x1x32xf32, #tpu.memory_space<vmem>>, %arg3: memref<8x1x32xf32, #tpu.memory_space<vmem>>, %arg4: memref<1x32xf32, #tpu.memory_space<vmem>>) attributes {dimension_semantics = [#tpu.dimension_semantics<parallel>, #tpu.dimension_semantics<arbitrary>], iteration_bounds = array<i64: 1, 1>, scalar_prefetch = 0 : i64, scratch_operands = 1 : i64, tpu.core_type = #tpu.core_type<tc>, window_params = [{transform_indices = @transform_0, window_bounds = array<i64: 8, 1, 32>}, {transform_indices = @transform_1, window_bounds = array<i64: 8, 1, 32>}]} {
    %0 = tpu.iota {dimensions = array<i32: 1>} : vector<1x32xi32>
    %c16_i32 = arith.constant 16 : i32
    %c0_i32 = arith.constant 0 : i32
    %1 = arith.cmpi eq, %c16_i32, %c0_i32 : i32
    %c1_i32 = arith.constant 1 : i32
    %2 = arith.select %1, %c1_i32, %c16_i32 : i32
    %3 = vector.broadcast %2 : i32 to vector<1x32xi32>
    %4 = arith.remsi %0, %3 : vector<1x32xi32>
    %c0_i32_0 = arith.constant 0 : i32
    %5 = vector.broadcast %c0_i32_0 : i32 to vector<1x32xi32>
    %6 = arith.cmpi ne, %4, %5 : vector<1x32xi32>
    %c0_i32_1 = arith.constant 0 : i32
    %7 = vector.broadcast %c0_i32_1 : i32 to vector<1x32xi32>
    %8 = arith.cmpi slt, %4, %7 : vector<1x32xi32>
    %c0_i32_2 = arith.constant 0 : i32
    %9 = arith.cmpi slt, %2, %c0_i32_2 : i32
    %10 = vector.broadcast %9 : i1 to vector<1x32xi1>
    %11 = vector.broadcast %10 : vector<1x32xi1> to vector<1x32xi1>
    %12 = arith.xori %8, %11 : vector<1x32xi1>
    %13 = arith.andi %12, %6 : vector<1x32xi1>
    %14 = vector.broadcast %2 : i32 to vector<1x32xi32>
    %15 = arith.addi %4, %14 : vector<1x32xi32>
    %16 = arith.select %13, %15, %4 : vector<1x32xi1>, vector<1x32xi32>
    %c0_i32_3 = arith.constant 0 : i32
    %17 = vector.broadcast %c0_i32_3 : i32 to vector<1x32xi32>
    %18 = arith.cmpi eq, %16, %17 : vector<1x32xi32>
    %c0_i32_4 = arith.constant 0 : i32
    %19 = arith.cmpi eq, %arg1, %c0_i32_4 : i32
    %20 = arith.extui %19 : i1 to i32
    %c0_i32_5 = arith.constant 0 : i32
    %21 = arith.cmpi ne, %20, %c0_i32_5 : i32
    scf.if %21 {
      %c0_54 = arith.constant 0 : index
      %c0_55 = arith.constant 0 : index
      %c0_56 = arith.constant 0 : index
      %111 = vector.load %arg2[%c0_54, %c0_55, %c0_56] : memref<8x1x32xf32, #tpu.memory_space<vmem>>, vector<1x1x32xf32>
      %112 = vector.shape_cast %111 : vector<1x1x32xf32> to vector<1x32xf32>
      %c0_57 = arith.constant 0 : index
      %c0_58 = arith.constant 0 : index
      %c0_59 = arith.constant 0 : index
      %113 = vector.load %arg3[%c0_57, %c0_58, %c0_59] : memref<8x1x32xf32, #tpu.memory_space<vmem>>, vector<1x1x32xf32>
      %114 = vector.shape_cast %113 : vector<1x1x32xf32> to vector<1x32xf32>
      %115 = vector.shape_cast %112 : vector<1x32xf32> to vector<1x1x32xf32>
      tpu.vector_store %arg3[%c0_57, %c0_58, %c0_59], %115 {strides = array<i32>} : memref<8x1x32xf32, #tpu.memory_space<vmem>>, vector<1x1x32xf32>,
      %c0_60 = arith.constant 0 : index
      %c0_61 = arith.constant 0 : index
      %116 = vector.load %arg4[%c0_60, %c0_61] : memref<1x32xf32, #tpu.memory_space<vmem>>, vector<1x32xf32>
      tpu.vector_store %arg4[%c0_60, %c0_61], %112 {strides = array<i32>} : memref<1x32xf32, #tpu.memory_space<vmem>>, vector<1x32xf32>,
    } else {
    }
    %c0_i32_6 = arith.constant 0 : i32
    %22 = arith.cmpi sgt, %arg1, %c0_i32_6 : i32
    %23 = arith.extui %22 : i1 to i32
    %c0_i32_7 = arith.constant 0 : i32
    %24 = arith.cmpi ne, %23, %c0_i32_7 : i32
    scf.if %24 {
      %c0_54 = arith.constant 0 : index
      %c0_55 = arith.constant 0 : index
      %c0_56 = arith.constant 0 : index
      %111 = vector.load %arg2[%c0_54, %c0_55, %c0_56] : memref<8x1x32xf32, #tpu.memory_space<vmem>>, vector<1x1x32xf32>
      %112 = vector.shape_cast %111 : vector<1x1x32xf32> to vector<1x32xf32>
      %c0_57 = arith.constant 0 : index
      %c0_58 = arith.constant 0 : index
      %113 = vector.load %arg4[%c0_57, %c0_58] : memref<1x32xf32, #tpu.memory_space<vmem>>, vector<1x32xf32>
      %c1_i32_59 = arith.constant 1 : i32
      %114 = tpu.dynamic_rotate %113 by %c1_i32_59 dim 1 : vector<1x32xf32>, i32 -> vector<1x32xf32>
      %cst_60 = arith.constant 0xFF800000 : f32
      %115 = vector.broadcast %cst_60 : f32 to vector<1x32xf32>
      %116 = arith.select %18, %115, %114 : vector<1x32xi1>, vector<1x32xf32>
      %117 = arith.maximumf %113, %116 : vector<1x32xf32>
      %118 = arith.addf %112, %117 : vector<1x32xf32>
      %c0_61 = arith.constant 0 : index
      %c0_62 = arith.constant 0 : index
      %c0_63 = arith.constant 0 : index
      %119 = vector.load %arg3[%c0_61, %c0_62, %c0_63] : memref<8x1x32xf32, #tpu.memory_space<vmem>>, vector<1x1x32xf32>
      %120 = vector.shape_cast %119 : vector<1x1x32xf32> to vector<1x32xf32>
      %121 = vector.shape_cast %118 : vector<1x32xf32> to vector<1x1x32xf32>
      tpu.vector_store %arg3[%c0_61, %c0_62, %c0_63], %121 {strides = array<i32>} : memref<8x1x32xf32, #tpu.memory_space<vmem>>, vector<1x1x32xf32>,
      %c0_64 = arith.constant 0 : index
      %c0_65 = arith.constant 0 : index
      %122 = vector.load %arg4[%c0_64, %c0_65] : memref<1x32xf32, #tpu.memory_space<vmem>>, vector<1x32xf32>
      tpu.vector_store %arg4[%c0_64, %c0_65], %118 {strides = array<i32>} : memref<1x32xf32, #tpu.memory_space<vmem>>, vector<1x32xf32>,
    } else {
    }
    %c0 = arith.constant 0 : index
    %c0_8 = arith.constant 0 : index
    %25 = vector.load %arg4[%c0, %c0_8] : memref<1x32xf32, #tpu.memory_space<vmem>>, vector<1x32xf32>
    %c1_i32_9 = arith.constant 1 : i32
    %26 = arith.index_cast %c1_i32_9 : i32 to index
    %c0_10 = arith.constant 0 : index
    %c0_11 = arith.constant 0 : index
    %27 = vector.load %arg2[%26, %c0_10, %c0_11] : memref<8x1x32xf32, #tpu.memory_space<vmem>>, vector<1x1x32xf32>
    %28 = vector.shape_cast %27 : vector<1x1x32xf32> to vector<1x32xf32>
    %c1_i32_12 = arith.constant 1 : i32
    %29 = tpu.dynamic_rotate %25 by %c1_i32_12 dim 1 : vector<1x32xf32>, i32 -> vector<1x32xf32>
    %cst = arith.constant 0xFF800000 : f32
    %30 = vector.broadcast %cst : f32 to vector<1x32xf32>
    %31 = arith.select %18, %30, %29 : vector<1x32xi1>, vector<1x32xf32>
    %32 = arith.maximumf %25, %31 : vector<1x32xf32>
    %33 = arith.addf %28, %32 : vector<1x32xf32>
    %34 = arith.index_cast %c1_i32_9 : i32 to index
    %c0_13 = arith.constant 0 : index
    %c0_14 = arith.constant 0 : index
    %35 = vector.load %arg3[%34, %c0_13, %c0_14] : memref<8x1x32xf32, #tpu.memory_space<vmem>>, vector<1x1x32xf32>
    %36 = vector.shape_cast %35 : vector<1x1x32xf32> to vector<1x32xf32>
    %37 = vector.shape_cast %33 : vector<1x32xf32> to vector<1x1x32xf32>
    tpu.vector_store %arg3[%34, %c0_13, %c0_14], %37 {strides = array<i32>} : memref<8x1x32xf32, #tpu.memory_space<vmem>>, vector<1x1x32xf32>,
    %c2_i32 = arith.constant 2 : i32
    %38 = arith.index_cast %c2_i32 : i32 to index
    %c0_15 = arith.constant 0 : index
    %c0_16 = arith.constant 0 : index
    %39 = vector.load %arg2[%38, %c0_15, %c0_16] : memref<8x1x32xf32, #tpu.memory_space<vmem>>, vector<1x1x32xf32>
    %40 = vector.shape_cast %39 : vector<1x1x32xf32> to vector<1x32xf32>
    %c1_i32_17 = arith.constant 1 : i32
    %41 = tpu.dynamic_rotate %33 by %c1_i32_17 dim 1 : vector<1x32xf32>, i32 -> vector<1x32xf32>
    %cst_18 = arith.constant 0xFF800000 : f32
    %42 = vector.broadcast %cst_18 : f32 to vector<1x32xf32>
    %43 = arith.select %18, %42, %41 : vector<1x32xi1>, vector<1x32xf32>
    %44 = arith.maximumf %33, %43 : vector<1x32xf32>
    %45 = arith.addf %40, %44 : vector<1x32xf32>
    %46 = arith.index_cast %c2_i32 : i32 to index
    %c0_19 = arith.constant 0 : index
    %c0_20 = arith.constant 0 : index
    %47 = vector.load %arg3[%46, %c0_19, %c0_20] : memref<8x1x32xf32, #tpu.memory_space<vmem>>, vector<1x1x32xf32>
    %48 = vector.shape_cast %47 : vector<1x1x32xf32> to vector<1x32xf32>
    %49 = vector.shape_cast %45 : vector<1x32xf32> to vector<1x1x32xf32>
    tpu.vector_store %arg3[%46, %c0_19, %c0_20], %49 {strides = array<i32>} : memref<8x1x32xf32, #tpu.memory_space<vmem>>, vector<1x1x32xf32>,
    %c3_i32 = arith.constant 3 : i32
    %50 = arith.index_cast %c3_i32 : i32 to index
    %c0_21 = arith.constant 0 : index
    %c0_22 = arith.constant 0 : index
    %51 = vector.load %arg2[%50, %c0_21, %c0_22] : memref<8x1x32xf32, #tpu.memory_space<vmem>>, vector<1x1x32xf32>
    %52 = vector.shape_cast %51 : vector<1x1x32xf32> to vector<1x32xf32>
    %c1_i32_23 = arith.constant 1 : i32
    %53 = tpu.dynamic_rotate %45 by %c1_i32_23 dim 1 : vector<1x32xf32>, i32 -> vector<1x32xf32>
    %cst_24 = arith.constant 0xFF800000 : f32
    %54 = vector.broadcast %cst_24 : f32 to vector<1x32xf32>
    %55 = arith.select %18, %54, %53 : vector<1x32xi1>, vector<1x32xf32>
    %56 = arith.maximumf %45, %55 : vector<1x32xf32>
    %57 = arith.addf %52, %56 : vector<1x32xf32>
    %58 = arith.index_cast %c3_i32 : i32 to index
    %c0_25 = arith.constant 0 : index
    %c0_26 = arith.constant 0 : index
    %59 = vector.load %arg3[%58, %c0_25, %c0_26] : memref<8x1x32xf32, #tpu.memory_space<vmem>>, vector<1x1x32xf32>
    %60 = vector.shape_cast %59 : vector<1x1x32xf32> to vector<1x32xf32>
    %61 = vector.shape_cast %57 : vector<1x32xf32> to vector<1x1x32xf32>
    tpu.vector_store %arg3[%58, %c0_25, %c0_26], %61 {strides = array<i32>} : memref<8x1x32xf32, #tpu.memory_space<vmem>>, vector<1x1x32xf32>,
    %c4_i32 = arith.constant 4 : i32
    %62 = arith.index_cast %c4_i32 : i32 to index
    %c0_27 = arith.constant 0 : index
    %c0_28 = arith.constant 0 : index
    %63 = vector.load %arg2[%62, %c0_27, %c0_28] : memref<8x1x32xf32, #tpu.memory_space<vmem>>, vector<1x1x32xf32>
    %64 = vector.shape_cast %63 : vector<1x1x32xf32> to vector<1x32xf32>
    %c1_i32_29 = arith.constant 1 : i32
    %65 = tpu.dynamic_rotate %57 by %c1_i32_29 dim 1 : vector<1x32xf32>, i32 -> vector<1x32xf32>
    %cst_30 = arith.constant 0xFF800000 : f32
    %66 = vector.broadcast %cst_30 : f32 to vector<1x32xf32>
    %67 = arith.select %18, %66, %65 : vector<1x32xi1>, vector<1x32xf32>
    %68 = arith.maximumf %57, %67 : vector<1x32xf32>
    %69 = arith.addf %64, %68 : vector<1x32xf32>
    %70 = arith.index_cast %c4_i32 : i32 to index
    %c0_31 = arith.constant 0 : index
    %c0_32 = arith.constant 0 : index
    %71 = vector.load %arg3[%70, %c0_31, %c0_32] : memref<8x1x32xf32, #tpu.memory_space<vmem>>, vector<1x1x32xf32>
    %72 = vector.shape_cast %71 : vector<1x1x32xf32> to vector<1x32xf32>
    %73 = vector.shape_cast %69 : vector<1x32xf32> to vector<1x1x32xf32>
    tpu.vector_store %arg3[%70, %c0_31, %c0_32], %73 {strides = array<i32>} : memref<8x1x32xf32, #tpu.memory_space<vmem>>, vector<1x1x32xf32>,
    %c5_i32 = arith.constant 5 : i32
    %74 = arith.index_cast %c5_i32 : i32 to index
    %c0_33 = arith.constant 0 : index
    %c0_34 = arith.constant 0 : index
    %75 = vector.load %arg2[%74, %c0_33, %c0_34] : memref<8x1x32xf32, #tpu.memory_space<vmem>>, vector<1x1x32xf32>
    %76 = vector.shape_cast %75 : vector<1x1x32xf32> to vector<1x32xf32>
    %c1_i32_35 = arith.constant 1 : i32
    %77 = tpu.dynamic_rotate %69 by %c1_i32_35 dim 1 : vector<1x32xf32>, i32 -> vector<1x32xf32>
    %cst_36 = arith.constant 0xFF800000 : f32
    %78 = vector.broadcast %cst_36 : f32 to vector<1x32xf32>
    %79 = arith.select %18, %78, %77 : vector<1x32xi1>, vector<1x32xf32>
    %80 = arith.maximumf %69, %79 : vector<1x32xf32>
    %81 = arith.addf %76, %80 : vector<1x32xf32>
    %82 = arith.index_cast %c5_i32 : i32 to index
    %c0_37 = arith.constant 0 : index
    %c0_38 = arith.constant 0 : index
    %83 = vector.load %arg3[%82, %c0_37, %c0_38] : memref<8x1x32xf32, #tpu.memory_space<vmem>>, vector<1x1x32xf32>
    %84 = vector.shape_cast %83 : vector<1x1x32xf32> to vector<1x32xf32>
    %85 = vector.shape_cast %81 : vector<1x32xf32> to vector<1x1x32xf32>
    tpu.vector_store %arg3[%82, %c0_37, %c0_38], %85 {strides = array<i32>} : memref<8x1x32xf32, #tpu.memory_space<vmem>>, vector<1x1x32xf32>,
    %c6_i32 = arith.constant 6 : i32
    %86 = arith.index_cast %c6_i32 : i32 to index
    %c0_39 = arith.constant 0 : index
    %c0_40 = arith.constant 0 : index
    %87 = vector.load %arg2[%86, %c0_39, %c0_40] : memref<8x1x32xf32, #tpu.memory_space<vmem>>, vector<1x1x32xf32>
    %88 = vector.shape_cast %87 : vector<1x1x32xf32> to vector<1x32xf32>
    %c1_i32_41 = arith.constant 1 : i32
    %89 = tpu.dynamic_rotate %81 by %c1_i32_41 dim 1 : vector<1x32xf32>, i32 -> vector<1x32xf32>
    %cst_42 = arith.constant 0xFF800000 : f32
    %90 = vector.broadcast %cst_42 : f32 to vector<1x32xf32>
    %91 = arith.select %18, %90, %89 : vector<1x32xi1>, vector<1x32xf32>
    %92 = arith.maximumf %81, %91 : vector<1x32xf32>
    %93 = arith.addf %88, %92 : vector<1x32xf32>
    %94 = arith.index_cast %c6_i32 : i32 to index
    %c0_43 = arith.constant 0 : index
    %c0_44 = arith.constant 0 : index
    %95 = vector.load %arg3[%94, %c0_43, %c0_44] : memref<8x1x32xf32, #tpu.memory_space<vmem>>, vector<1x1x32xf32>
    %96 = vector.shape_cast %95 : vector<1x1x32xf32> to vector<1x32xf32>
    %97 = vector.shape_cast %93 : vector<1x32xf32> to vector<1x1x32xf32>
    tpu.vector_store %arg3[%94, %c0_43, %c0_44], %97 {strides = array<i32>} : memref<8x1x32xf32, #tpu.memory_space<vmem>>, vector<1x1x32xf32>,
    %c7_i32 = arith.constant 7 : i32
    %98 = arith.index_cast %c7_i32 : i32 to index
    %c0_45 = arith.constant 0 : index
    %c0_46 = arith.constant 0 : index
    %99 = vector.load %arg2[%98, %c0_45, %c0_46] : memref<8x1x32xf32, #tpu.memory_space<vmem>>, vector<1x1x32xf32>
    %100 = vector.shape_cast %99 : vector<1x1x32xf32> to vector<1x32xf32>
    %c1_i32_47 = arith.constant 1 : i32
    %101 = tpu.dynamic_rotate %93 by %c1_i32_47 dim 1 : vector<1x32xf32>, i32 -> vector<1x32xf32>
    %cst_48 = arith.constant 0xFF800000 : f32
    %102 = vector.broadcast %cst_48 : f32 to vector<1x32xf32>
    %103 = arith.select %18, %102, %101 : vector<1x32xi1>, vector<1x32xf32>
    %104 = arith.maximumf %93, %103 : vector<1x32xf32>
    %105 = arith.addf %100, %104 : vector<1x32xf32>
    %106 = arith.index_cast %c7_i32 : i32 to index
    %c0_49 = arith.constant 0 : index
    %c0_50 = arith.constant 0 : index
    %107 = vector.load %arg3[%106, %c0_49, %c0_50] : memref<8x1x32xf32, #tpu.memory_space<vmem>>, vector<1x1x32xf32>
    %108 = vector.shape_cast %107 : vector<1x1x32xf32> to vector<1x32xf32>
    %109 = vector.shape_cast %105 : vector<1x32xf32> to vector<1x1x32xf32>
    tpu.vector_store %arg3[%106, %c0_49, %c0_50], %109 {strides = array<i32>} : memref<8x1x32xf32, #tpu.memory_space<vmem>>, vector<1x1x32xf32>,
    %c7_i32_51 = arith.constant 7 : i32
    %c0_52 = arith.constant 0 : index
    %c0_53 = arith.constant 0 : index
    %110 = vector.load %arg4[%c0_52, %c0_53] : memref<1x32xf32, #tpu.memory_space<vmem>>, vector<1x32xf32>
    tpu.vector_store %arg4[%c0_52, %c0_53], %105 {strides = array<i32>} : memref<1x32xf32, #tpu.memory_space<vmem>>, vector<1x32xf32>,
    return
  }
  func.func @transform_0(%arg0: i32, %arg1: i32) -> (i32, i32, i32) {
    %c0_i32 = arith.constant 0 : i32
    %c0_i32_0 = arith.constant 0 : i32
    return %arg1, %arg0, %c0_i32 : i32, i32, i32
  }
  func.func @transform_1(%arg0: i32, %arg1: i32) -> (i32, i32, i32) {
    %c0_i32 = arith.constant 0 : i32
    %c0_i32_0 = arith.constant 0 : i32
    return %arg1, %arg0, %c0_i32 : i32, i32, i32
  }
}

</mosaic_0001>

<bundles_post_ra>
// kernel: tpu_custom_call.1
= control target key start
LH: loop header
LB: loop body
LE: loop exit
PB: predicated region body
PF: predicated region fallthrough
CT: control target
= control target key end

     0   :  { %6 = vsyncpa [#allocation4], 0  ;;  %s350_s0 = inlined_call_operand.hbm [shape: f32[8,1,32], index: 0, kind: input, shape index: {}]   ;;  %s351_s1 = inlined_call_operand.hbm [shape: f32[8,1,32], index: 1, kind: output, shape index: {}]  }
   0x1   :  { %7 = vsyncpa [#allocation5], 0  ;;  %s259_s6 = smov [#allocation3]  }
   0x2   :  { %s13_s7 = sshll.u32 %s259_s6, 4  ;;  %s14_s7 = int_to_ptr.vmem [resolvable:$true] %s13_s7 }
   0x3   :  { %s223_s8 = scalar_lea.vmem %s14_s7, 128  ;;  %p228_p1 = scmp.lt.s32.totalorder %s14_s7, %s14_s7 }
   0x4   :  { %p224_p0 = scmp.ne.s32.totalorder %s14_s7, %s223_s8  ;;  %p229_p2 = scmp.lt.s32.totalorder %s223_s8, %s223_s8 }
   0x6   :  { %p230_p3 = por %p229_p2, %p228_p1 }
   0x8   :  { %p231_p4 = pnand %p230_p3, %p224_p0 }
   0xa   :  { %234 = shalt.err (!%p231_p4)
}
   0xb   :  { %s260_s9 = smov 16   ;;  %s261_s10 = smov 1  }
   0xc   :  { %19 = dma.hbm_to_vmem [thread:$0]  %s350_s0, 128, %s14_s7, [#allocation4], %s260_s9, %s260_s9, %s261_s10  }
   0xd   :  { %255 = dma.done.wait [#allocation4], 128  }
   0xe   :  { %256 = vsyncadd [#allocation4], 4294967168  ;;  %vm43_vm0 = vcmask 253952   ;;  %v42_v0 = vld [vmem:[#allocation3] sm:$0x1]  ;;  %s262_s13 = smov 32   ;;  %v23_v6 = vlaneseq }
   0xf   :  { %45 = vst.msk [vmem:[#allocation2] sm:$0x1] %vm43_vm0, %v42_v0  ;;  %44 = vst.msk [vmem:[#allocation6] sm:$0x1] %vm43_vm0, %v42_v0  ;;  %vm72_vm1 = vcmask 1047808   ;;  %s263_s0 = smov 97  }
  0x10   :  { %v24_v7 = vand.u32 127, %v23_v6  ;;  %v71_v11 = vld [vmem:[#allocation3 + $0x1] sm:$0x1]  ;;  %v90_v20 = vld [vmem:[#allocation3 + $0x2] sm:$0x1]  ;;  %s264_s14 = smov [#allocation6]  }
  0x11   :  { %v107_v29 = vld [vmem:[#allocation3 + $0x3] sm:$0x1]  ;;  %v124_v38 = vld [vmem:[#allocation3 + $0x4] sm:$0x1]  ;;  %v141_v47 = vld [vmem:[#allocation3 + $0x5] sm:$0x1] }
  0x12   :  { %v29_v8 = vand.u32 15, %v24_v7  ;;  %v158_v56 = vld [vmem:[#allocation3 + $0x6] sm:$0x1]  ;;  %s197_s15 = sshll.u32 %s264_s14, 4  ;;  %s198_s15 = int_to_ptr.vmem [resolvable:$true] %s197_s15 }
  0x13   :  { %s235_s16 = scalar_lea.vmem %s198_s15, 128  ;;  %p240_p6 = scmp.lt.s32.totalorder %s198_s15, %s198_s15 }
  0x14   :  { %vm288_vm2 = vcmp.eq.s32.totalorder %v29_v8, 0  ;;  %p236_p5 = scmp.ne.s32.totalorder %s198_s15, %s235_s16  ;;  %p241_p7 = scmp.lt.s32.totalorder %s235_s16, %s235_s16 }
  0x16   :  { %v69_v1 = vld [vmem:[#allocation2] sm:$0x1]  ;;  %p242_p8 = por %p241_p7, %p240_p6 }
  0x17   :  { %73 = vrot.lane.b32.xlu0 %v69_v1, %s262_s13 }
  0x18   :  { %p243_p9 = pnand %p242_p8, %p236_p5 }
  0x89   :  { %v74_v2 = vpop.permute.xlu0 %73 }
  0x8a   :  { %v75_v3 = vsel %vm72_vm1, %v74_v2, %v69_v1 }
  0x8b   :  { %76 = vrot.lane.b32.xlu0 %v75_v3, %s262_s13 }
  0xfd   :  { %v77_v4 = vpop.permute.xlu0 %76 }
  0xfe   :  { %v78_v5 = vsel %vm72_vm1, %v77_v4, %v69_v1 }
  0xff   :  { %80 = vrot.lane.b32.xlu1 %v78_v5, %s263_s0 }
 0x171   :  { %v81_v10 = vpop.permute.xlu1 %80 }
 0x172   :  { %v83_v12 = vsel %vm288_vm2, -inf, %v81_v10 }
 0x173   :  { %v84_v13 = vmax.f32 %v69_v1, %v83_v12  ;;  %v175_v1 = vld [vmem:[#allocation3 + $0x7] sm:$0x1] }
 0x175   :  { %v85_v14 = vadd.f32 %v84_v13, %v71_v11 }
 0x177   :  { %88 = vst.msk [vmem:[#allocation6 + $0x1] sm:$0x1] %vm43_vm0, %v85_v14  ;;  %91 = vrot.lane.b32.xlu1 %v85_v14, %s262_s13 }
 0x1e9   :  { %v92_v15 = vpop.permute.xlu1 %91 }
 0x1ea   :  { %v93_v16 = vsel %vm72_vm1, %v92_v15, %v85_v14 }
 0x1eb   :  { %94 = vrot.lane.b32.xlu0 %v93_v16, %s262_s13 }
 0x25d   :  { %v95_v17 = vpop.permute.xlu0 %94 }
 0x25e   :  { %v96_v18 = vsel %vm72_vm1, %v95_v17, %v85_v14 }
 0x25f   :  { %98 = vrot.lane.b32.xlu1 %v96_v18, %s263_s0 }
 0x2d1   :  { %v99_v19 = vpop.permute.xlu1 %98 }
 0x2d2   :  { %v101_v21 = vsel %vm288_vm2, -inf, %v99_v19 }
 0x2d3   :  { %v102_v22 = vmax.f32 %v85_v14, %v101_v21 }
 0x2d5   :  { %v103_v23 = vadd.f32 %v102_v22, %v90_v20 }
 0x2d7   :  { %105 = vst.msk [vmem:[#allocation6 + $0x2] sm:$0x1] %vm43_vm0, %v103_v23  ;;  %108 = vrot.lane.b32.xlu0 %v103_v23, %s262_s13 }
 0x349   :  { %v109_v24 = vpop.permute.xlu0 %108 }
 0x34a   :  { %v110_v25 = vsel %vm72_vm1, %v109_v24, %v103_v23 }
 0x34b   :  { %111 = vrot.lane.b32.xlu1 %v110_v25, %s262_s13 }
 0x3bd   :  { %v112_v26 = vpop.permute.xlu1 %111 }
 0x3be   :  { %v113_v27 = vsel %vm72_vm1, %v112_v26, %v103_v23 }
 0x3bf   :  { %115 = vrot.lane.b32.xlu0 %v113_v27, %s263_s0 }
 0x431   :  { %v116_v28 = vpop.permute.xlu0 %115 }
 0x432   :  { %v118_v30 = vsel %vm288_vm2, -inf, %v116_v28 }
 0x433   :  { %v119_v31 = vmax.f32 %v103_v23, %v118_v30 }
 0x435   :  { %v120_v32 = vadd.f32 %v119_v31, %v107_v29 }
 0x437   :  { %122 = vst.msk [vmem:[#allocation6 + $0x3] sm:$0x1] %vm43_vm0, %v120_v32  ;;  %125 = vrot.lane.b32.xlu1 %v120_v32, %s262_s13 }
 0x4a9   :  { %v126_v33 = vpop.permute.xlu1 %125 }
 0x4aa   :  { %v127_v34 = vsel %vm72_vm1, %v126_v33, %v120_v32 }
 0x4ab   :  { %128 = vrot.lane.b32.xlu0 %v127_v34, %s262_s13 }
 0x51d   :  { %v129_v35 = vpop.permute.xlu0 %128 }
 0x51e   :  { %v130_v36 = vsel %vm72_vm1, %v129_v35, %v120_v32 }
 0x51f   :  { %132 = vrot.lane.b32.xlu1 %v130_v36, %s263_s0 }
 0x591   :  { %v133_v37 = vpop.permute.xlu1 %132 }
 0x592   :  { %v135_v39 = vsel %vm288_vm2, -inf, %v133_v37 }
 0x593   :  { %v136_v40 = vmax.f32 %v120_v32, %v135_v39 }
 0x595   :  { %v137_v41 = vadd.f32 %v136_v40, %v124_v38 }
 0x597   :  { %139 = vst.msk [vmem:[#allocation6 + $0x4] sm:$0x1] %vm43_vm0, %v137_v41  ;;  %142 = vrot.lane.b32.xlu0 %v137_v41, %s262_s13 }
 0x609   :  { %v143_v42 = vpop.permute.xlu0 %142 }
 0x60a   :  { %v144_v43 = vsel %vm72_vm1, %v143_v42, %v137_v41 }
 0x60b   :  { %145 = vrot.lane.b32.xlu1 %v144_v43, %s262_s13 }
 0x67d   :  { %v146_v44 = vpop.permute.xlu1 %145 }
 0x67e   :  { %v147_v45 = vsel %vm72_vm1, %v146_v44, %v137_v41 }
 0x67f   :  { %149 = vrot.lane.b32.xlu0 %v147_v45, %s263_s0 }
 0x6f1   :  { %v150_v46 = vpop.permute.xlu0 %149 }
 0x6f2   :  { %v152_v48 = vsel %vm288_vm2, -inf, %v150_v46 }
 0x6f3   :  { %v153_v49 = vmax.f32 %v137_v41, %v152_v48 }
 0x6f5   :  { %v154_v50 = vadd.f32 %v153_v49, %v141_v47 }
 0x6f7   :  { %156 = vst.msk [vmem:[#allocation6 + $0x5] sm:$0x1] %vm43_vm0, %v154_v50  ;;  %159 = vrot.lane.b32.xlu1 %v154_v50, %s262_s13 }
 0x769   :  { %v160_v51 = vpop.permute.xlu1 %159 }
 0x76a   :  { %v161_v52 = vsel %vm72_vm1, %v160_v51, %v154_v50 }
 0x76b   :  { %162 = vrot.lane.b32.xlu0 %v161_v52, %s262_s13 }
 0x7dd   :  { %v163_v53 = vpop.permute.xlu0 %162 }
 0x7de   :  { %v164_v54 = vsel %vm72_vm1, %v163_v53, %v154_v50 }
 0x7df   :  { %166 = vrot.lane.b32.xlu1 %v164_v54, %s263_s0 }
 0x851   :  { %v167_v55 = vpop.permute.xlu1 %166 }
 0x852   :  { %v169_v57 = vsel %vm288_vm2, -inf, %v167_v55 }
 0x853   :  { %v170_v58 = vmax.f32 %v154_v50, %v169_v57 }
 0x855   :  { %v171_v59 = vadd.f32 %v170_v58, %v158_v56 }
 0x857   :  { %173 = vst.msk [vmem:[#allocation6 + $0x6] sm:$0x1] %vm43_vm0, %v171_v59  ;;  %176 = vrot.lane.b32.xlu0 %v171_v59, %s262_s13 }
 0x8c9   :  { %v177_v60 = vpop.permute.xlu0 %176 }
 0x8ca   :  { %v178_v61 = vsel %vm72_vm1, %v177_v60, %v171_v59 }
 0x8cb   :  { %179 = vrot.lane.b32.xlu1 %v178_v61, %s262_s13 }
 0x93d   :  { %v180_v62 = vpop.permute.xlu1 %179 }
 0x93e   :  { %v181_v63 = vsel %vm72_vm1, %v180_v62, %v171_v59 }
 0x93f   :  { %183 = vrot.lane.b32.xlu0 %v181_v63, %s263_s0 }
 0x9b1   :  { %v184_v0 = vpop.permute.xlu0 %183 }
 0x9b2   :  { %v186_v2 = vsel %vm288_vm2, -inf, %v184_v0 }
 0x9b3   :  { %v187_v3 = vmax.f32 %v171_v59, %v186_v2 }
 0x9b5   :  { %v188_v4 = vadd.f32 %v187_v3, %v175_v1 }
 0x9b7   :  { %190 = vst.msk [vmem:[#allocation6 + $0x7] sm:$0x1] %vm43_vm0, %v188_v4  ;;  %191 = vst.msk [vmem:[#allocation2] sm:$0x1] %vm43_vm0, %v188_v4 }
 0x9b8   :  { %246 = shalt.err (!%p243_p9)
}
 0x9b9   :  { %203 = dma.vmem_to_hbm [thread:$0]  %s198_s15, 128, %s351_s1, [#allocation5], %s260_s9, %s260_s9, %s261_s10  }
 0x9ba   :  { %257 = dma.done.wait [#allocation5], 128  }
 0x9bb   :  { %258 = vsyncadd [#allocation5], 4294967168 }
 0x9bc   :  { %207 = vsyncpa [#allocation4], 1 }
 0x9bd   :  { %208 = vsyncpa [#allocation5], 1 }

</bundles_post_ra>
